<compile_context>
chip_gen: v7x
topology: tpu7x:2x2x1
jax: 0.10.0
libtpu: 0.0.40
codegen_flags: <defaults>
</compile_context>

<pallas_src>
import math

import numpy as np

import jax
import jax.numpy as jnp
from jax.experimental import pallas as pl
from jax.experimental.pallas import tpu as pltpu


def _conv_as_matrix(w_khkwcico, bias, stride, pad, h_in, w_in):
    """Lower one Conv2d into an affine (M, b) pair on channels-last flattened images.

    Input flattened as  idx_in  = (h  * W_in  + w ) * Cin  + ci  (ci fastest)
    Output flattened as idx_out = (ho * W_out + wo) * Cout + co  (co fastest)
    so  out_flat = in_flat @ M + b  with
      M[(ih*W_in+iw)*Cin + ci, (oh*W_out+ow)*Cout + co] = w[kh, kw, ci, co]
        where ih = s*oh + kh - p, iw = s*ow + kw - p (structural zeros fold in the
        zero padding, the stride and the im2col scatter).  Built once, in float64.
    """
    k, _, ci, co = w_khkwcico.shape
    ho = (h_in + 2 * pad - k) // stride + 1
    wo = (w_in + 2 * pad - k) // stride + 1
    w64 = np.asarray(w_khkwcico, np.float64)
    mat = np.zeros((h_in * w_in * ci, ho * wo * co), np.float64)
    for oh in range(ho):
        for kh in range(k):
            ih = stride * oh + kh - pad
            if not (0 <= ih < h_in):
                continue
            for ow in range(wo):
                for kw in range(k):
                    iw = stride * ow + kw - pad
                    if not (0 <= iw < w_in):
                        continue
                    r0 = (ih * w_in + iw) * ci
                    c0 = (oh * wo + ow) * co
                    mat[r0:r0 + ci, c0:c0 + co] += w64[kh, kw]
    b_vec = np.tile(np.asarray(bias, np.float64), ho * wo)
    return mat, b_vec, ho, wo


def _stem_kernel(x_ref, w_ref, b_ref, o_ref):
    """(B_blk, K) @ (K, N) on the MXU with f32 accumulation, f32 bias add, lane-dense store."""
    acc = jnp.dot(x_ref[...], w_ref[...], preferred_element_type=jnp.float32)
    o_ref[...] = (acc + b_ref[...]).astype(o_ref.dtype)


class PatchEmbedding:
    """JAX/Pallas port of the PyTorch PatchEmbedding (STEM=True, norm=Identity)."""

    def __init__(self, key, input_size=16, patch_size=8, in_chans=4, embed_dim=32,
                 dtype=jnp.float32, mxu_input_dtype=jnp.bfloat16):
        # TODO(synk): only the STEM=True path with norm_layer=None (Identity) is ported;
        # the STEM=False single patchify conv branch is not implemented.
        # TODO(synk): the composed-W_eff approach targets small input_size (16x16 here);
        # at ViT-scale resolutions W_eff explodes and the per-layer (L, R) lowering with
        # bf16 params, single-buffered invariant blocks and an explicit vmem_limit_bytes
        # should be used instead.
        self.input_size = (input_size, input_size)
        self.dtype = dtype
        self.embed_dim = embed_dim
        self.mxu_input_dtype = mxu_input_dtype
        hidden_dim = embed_dim // in_chans
        mid = in_chans * hidden_dim // 2
        # (k, stride, pad, Cin, Cout); weights stored in (kh, kw, Cin, Cout) layout.
        # (Real PyTorch weights need a (Cout,Cin,kh,kw) -> (kh,kw,Cin,Cout) permute.)
        self.conv_cfg = [
            (3, 2, 1, in_chans, mid),
            (3, 2, 1, mid, mid),
            (3, 2, 1, mid, embed_dim),
            (1, 1, 0, embed_dim, embed_dim),
        ]
        keys = jax.random.split(key, 2 * len(self.conv_cfg))
        self.raw_params = []
        w_eff = None
        b_eff = None
        h, w_sp = input_size, input_size
        for i, (k, s, p, ci, co) in enumerate(self.conv_cfg):
            fan_in = k * k * ci
            bound = 1.0 / math.sqrt(fan_in)          # PyTorch Conv2d default init range
            wgt = jax.random.uniform(keys[2 * i], (k, k, ci, co), dtype, -bound, bound)
            bias = jax.random.uniform(keys[2 * i + 1], (co,), dtype, -bound, bound)
            self.raw_params.append((wgt, bias))
            mat, b_vec, ho, wo = _conv_as_matrix(np.asarray(wgt, np.float64),
                                                 np.asarray(bias, np.float64),
                                                 s, p, h, w_sp)
            if w_eff is None:
                w_eff, b_eff = mat, b_vec
            else:
                w_eff = w_eff @ mat                  # exact affine composition (float64)
                b_eff = b_eff @ mat + b_vec
            h, w_sp = ho, wo
        self.out_hw = (h, w_sp)
        self.in_features = input_size * input_size * in_chans
        self.out_features = h * w_sp * embed_dim
        # Params pre-cast ONCE: bf16 W_eff for the MXU, f32 bias row for the VPU add.
        self.w_eff = jnp.asarray(w_eff, mxu_input_dtype)
        self.b_eff = jnp.asarray(b_eff, jnp.float32).reshape(1, self.out_features)
        self._forward = jax.jit(self._forward_impl)   # single executable per forward

    def _forward_impl(self, x_nchw, w_eff, b_eff):
        B, C, H, W = x_nchw.shape
        ho, wo = self.out_hw
        E = self.embed_dim
        K = self.in_features
        N = self.out_features

        # NCHW -> NHWC -> (B, H*W*C), shipped directly in the MXU input dtype
        # (no in-kernel activation casts).  Layout glue only; fused under jit.
        x_flat = jnp.transpose(x_nchw, (0, 2, 3, 1)).reshape(B, K).astype(self.mxu_input_dtype)

        # Batch blocking: B_blk images stacked on the sublane/M axis per grid step.
        b_align = ((B + 7) // 8) * 8                 # sublane alignment
        b_blk = min(128, b_align)                    # M=128 fills the v5e MXU; fine on v6e/v7x
        b_pad = ((B + b_blk - 1) // b_blk) * b_blk
        if b_pad != B:
            x_flat = jnp.pad(x_flat, ((0, b_pad - B), (0, 0)))
        grid = (b_pad // b_blk,)

        itemsize_in = jnp.dtype(self.mxu_input_dtype).itemsize
        cost = pl.CostEstimate(
            flops=2 * b_pad * K * N,
            transcendentals=0,
            bytes_accessed=(b_pad * K * itemsize_in            # activations
                            + K * N * itemsize_in              # W_eff
                            + N * 4                            # bias
                            + b_pad * N * jnp.dtype(self.dtype).itemsize))  # output

        out = pl.pallas_call(
            _stem_kernel,
            out_shape=jax.ShapeDtypeStruct((b_pad, N), self.dtype),
            grid=grid,
            in_specs=[
                pl.BlockSpec((b_blk, K), lambda i: (i, 0)),
                pl.BlockSpec((K, N), lambda i: (0, 0)),        # grid-invariant, resident
                pl.BlockSpec((1, N), lambda i: (0, 0)),        # grid-invariant, resident
            ],
            out_specs=pl.BlockSpec((b_blk, N), lambda i: (i, 0)),
            compiler_params=pltpu.CompilerParams(
                dimension_semantics=("parallel",)),            # batch blocks shard across v7x's 2 TCs
            cost_estimate=cost,
        )(x_flat, w_eff, b_eff)

        # (B, Ho*Wo*E) -> (B, Ho*Wo, E) == PyTorch's proj(x).flatten(2).transpose(1, 2)
        return out[:B].reshape(B, ho * wo, E)

    def __call__(self, x_nchw):
        _, _, H, W = x_nchw.shape
        assert H == self.input_size[0] and W == self.input_size[1], (
            f"Input image size ({H}*{W}) doesn't match expected model input "
            f"({self.input_size[0]}*{self.input_size[1]})")
        return self._forward(x_nchw, self.w_eff, self.b_eff)


def _reference_forward(x_nchw, raw_params, conv_cfg):
    """Pure-JAX (XLA conv) reference for the numerical self-check."""
    x = x_nchw
    for (wgt, bias), (k, s, p, ci, co) in zip(raw_params, conv_cfg):
        w_oihw = jnp.transpose(wgt, (3, 2, 0, 1))
        x = jax.lax.conv_general_dilated(
            x, w_oihw, window_strides=(s, s), padding=[(p, p), (p, p)],
            dimension_numbers=("NCHW", "OIHW", "NCHW"),
            precision=jax.lax.Precision.HIGHEST)
        x = x + bias.reshape(1, co, 1, 1)
    B, E, Ho, Wo = x.shape
    return jnp.transpose(x.reshape(B, E, Ho * Wo), (0, 2, 1))


if __name__ == "__main__":
    key = jax.random.PRNGKey(0)
    k_param, k_input = jax.random.split(key)

    # Small config consistent with the module: input 16x16, 4 channels, embed 32.
    B, C, H, W = 2, 4, 16, 16
    embed_dim = 32

    model = PatchEmbedding(k_param, input_size=H, in_chans=C, embed_dim=embed_dim)
    x = jax.random.normal(k_input, (B, C, H, W), dtype=jnp.float32)

    out = jax.block_until_ready(model(x))
    # 16 -> 8 -> 4 -> 2 spatial; sequence length = 2*2 = 4
    assert out.shape == (B, 4, embed_dim), out.shape

    # Numerical self-check vs a pure-JAX conv reference.  Tolerance covers the bf16
    # rounding of W_eff / activations; a structural/indexing bug would be O(1) off.
    # (mxu_input_dtype=jnp.float32 is the full-precision escape hatch.)
    ref = jax.block_until_ready(_reference_forward(x, model.raw_params, model.conv_cfg))
    np.testing.assert_allclose(np.asarray(out), np.asarray(ref), rtol=3e-2, atol=3e-2)

    print("KERNEL_OK")
</pallas_src>

<mosaic_0001>
module attributes {stable_mosaic.version = 11 : i64} {
  func.func @_stem_kernel(%arg0: i32, %arg1: memref<8x1024xbf16, #tpu.memory_space<vmem>>, %arg2: memref<1024x128xbf16, #tpu.memory_space<vmem>>, %arg3: memref<1x128xf32, #tpu.memory_space<vmem>>, %arg4: memref<8x128xf32, #tpu.memory_space<vmem>>) attributes {dimension_semantics = [#tpu.dimension_semantics<parallel>], iteration_bounds = array<i64: 1>, scalar_prefetch = 0 : i64, scratch_operands = 0 : i64, tpu.core_type = #tpu.core_type<tc>, window_params = [{transform_indices = @transform_0, window_bounds = array<i64: 8, 1024>}, {pipeline_mode = #tpu.pipeline_mode<synchronous>, transform_indices = @transform_1, window_bounds = array<i64: 1024, 128>}, {pipeline_mode = #tpu.pipeline_mode<synchronous>, transform_indices = @transform_2, window_bounds = array<i64: 1, 128>}, {transform_indices = @transform_3, window_bounds = array<i64: 8, 128>}]} {
    %c0 = arith.constant 0 : index
    %c0_0 = arith.constant 0 : index
    %0 = vector.load %arg1[%c0, %c0_0] : memref<8x1024xbf16, #tpu.memory_space<vmem>>, vector<8x1024xbf16>
    %c0_1 = arith.constant 0 : index
    %c0_2 = arith.constant 0 : index
    %1 = vector.load %arg2[%c0_1, %c0_2] : memref<1024x128xbf16, #tpu.memory_space<vmem>>, vector<1024x128xbf16>
    %cst = arith.constant dense<0.000000e+00> : vector<8x128xf32>
    %2 = tpu.matmul %0, %1, %cst {dimension_numbers = #tpu.dot_dimension_numbers<[1], [0], [0], [1], [0, 0, 1, 1], [], []>} : vector<8x1024xbf16>, vector<1024x128xbf16>, vector<8x128xf32> -> vector<8x128xf32>
    %c0_3 = arith.constant 0 : index
    %c0_4 = arith.constant 0 : index
    %3 = vector.load %arg3[%c0_3, %c0_4] : memref<1x128xf32, #tpu.memory_space<vmem>>, vector<1x128xf32>
    %4 = vector.broadcast %3 : vector<1x128xf32> to vector<8x128xf32>
    %5 = arith.addf %2, %4 : vector<8x128xf32>
    %c0_5 = arith.constant 0 : index
    %c0_6 = arith.constant 0 : index
    %6 = vector.load %arg4[%c0_5, %c0_6] : memref<8x128xf32, #tpu.memory_space<vmem>>, vector<8x128xf32>
    tpu.vector_store %arg4[%c0_5, %c0_6], %5 {strides = array<i32>} : memref<8x128xf32, #tpu.memory_space<vmem>>, vector<8x128xf32>,
    return
  }
  func.func @transform_0(%arg0: i32) -> (i32, i32) {
    %c0_i32 = arith.constant 0 : i32
    %c0_i32_0 = arith.constant 0 : i32
    return %arg0, %c0_i32 : i32, i32
  }
  func.func @transform_1(%arg0: i32) -> (i32, i32) {
    %c0_i32 = arith.constant 0 : i32
    %c0_i32_0 = arith.constant 0 : i32
    %c0_i32_1 = arith.constant 0 : i32
    return %c0_i32, %c0_i32_0 : i32, i32
  }
  func.func @transform_2(%arg0: i32) -> (i32, i32) {
    %c0_i32 = arith.constant 0 : i32
    %c0_i32_0 = arith.constant 0 : i32
    %c0_i32_1 = arith.constant 0 : i32
    return %c0_i32, %c0_i32_0 : i32, i32
  }
  func.func @transform_3(%arg0: i32) -> (i32, i32) {
    %c0_i32 = arith.constant 0 : i32
    %c0_i32_0 = arith.constant 0 : i32
    return %arg0, %c0_i32 : i32, i32
  }
}

</mosaic_0001>

<bundles_post_ra>
// kernel: _forward_impl.1
= control target key start
LH: loop header
LB: loop body
LE: loop exit
PB: predicated region body
PF: predicated region fallthrough
CT: control target
= control target key end

     0   :  { %s1194_s1 = inlined_call_operand.vmem [shape: bf16[1024,128], index: 1, kind: input, shape index: {}]   ;;  %s1195_s0 = inlined_call_operand.vmem [shape: bf16[8,1024], index: 0, kind: input, shape index: {}]   ;;  %s1196_s2 = inlined_call_operand.vmem [shape: f32[1,128], index: 2, kind: input, shape index: {}]   ;;  %s1197_s3 = inlined_call_operand.vmem [shape: f32[8,128], index: 3, kind: output, shape index: {}]  }
   0x1   :  { %v892_v0 = vld [vmem:[%s1194_s1 + $0x40] sm:$0xff]   ;;  %v896_v4 = vld [vmem:[%s1194_s1 + $0x48] sm:$0xff]   ;;  %v900_v8 = vld [vmem:[%s1194_s1 + $0x50] sm:$0xff]  }
   0x2   :  { %v893_v1 = vld [vmem:[%s1194_s1 + $0xc0] sm:$0xff]   ;;  %804 = vmatprep.subr.bf16.mxu0 %v892_v0  ;;  %v897_v5 = vld [vmem:[%s1194_s1 + $0xc8] sm:$0xff]   ;;  %v901_v9 = vld [vmem:[%s1194_s1 + $0xd0] sm:$0xff]  }
   0x3   :  { %v894_v2 = vld [vmem:[%s1194_s1] sm:$0xff]   ;;  %826 = vmatprep.subr.bf16.mxu1 %v893_v1  ;;  %v898_v6 = vld [vmem:[%s1194_s1 + $0x8] sm:$0xff]   ;;  %v902_v10 = vld [vmem:[%s1194_s1 + $0x10] sm:$0xff]  }
   0x4   :  { %v895_v3 = vld [vmem:[%s1194_s1 + $0x80] sm:$0xff]   ;;  %805 = vmatpush3.bf16.msra.mxu0 %v894_v2  ;;  %v899_v7 = vld [vmem:[%s1194_s1 + $0x88] sm:$0xff]   ;;  %v903_v11 = vld [vmem:[%s1194_s1 + $0x90] sm:$0xff]  }
   0x5   :  { %827 = vmatpush3.bf16.msra.mxu1 %v895_v3  ;;  %806 = vmatprep.subr.bf16.mxu0 %v896_v4  ;;  %v904_v12 = vld [vmem:[%s1194_s1 + $0x58] sm:$0xff]   ;;  %v908_v16 = vld [vmem:[%s1194_s1 + $0x60] sm:$0xff]   ;;  %v912_v20 = vld [vmem:[%s1194_s1 + $0x68] sm:$0xff]  }
   0x6   :  { %828 = vmatprep.subr.bf16.mxu1 %v897_v5  ;;  %v905_v13 = vld [vmem:[%s1194_s1 + $0xd8] sm:$0xff]   ;;  %v909_v17 = vld [vmem:[%s1194_s1 + $0xe0] sm:$0xff]   ;;  %v913_v21 = vld [vmem:[%s1194_s1 + $0xe8] sm:$0xff]  }
   0x7   :  { %v906_v14 = vld [vmem:[%s1194_s1 + $0x18] sm:$0xff]   ;;  %v910_v18 = vld [vmem:[%s1194_s1 + $0x20] sm:$0xff]   ;;  %v914_v22 = vld [vmem:[%s1194_s1 + $0x28] sm:$0xff]  }
   0x8   :  { %807 = vmatpush3.bf16.msra.mxu0 %v898_v6  ;;  %v907_v15 = vld [vmem:[%s1194_s1 + $0x98] sm:$0xff]   ;;  %v911_v19 = vld [vmem:[%s1194_s1 + $0xa0] sm:$0xff]   ;;  %v915_v23 = vld [vmem:[%s1194_s1 + $0xa8] sm:$0xff]  }
   0x9   :  { %829 = vmatpush3.bf16.msra.mxu1 %v899_v7  ;;  %808 = vmatprep.subr.bf16.mxu0 %v900_v8  ;;  %v916_v24 = vld [vmem:[%s1194_s1 + $0x70] sm:$0xff]   ;;  %v920_v28 = vld [vmem:[%s1194_s1 + $0x78] sm:$0xff]   ;;  %v15_v32 = vld [vmem:[%s1195_s0] sm:$0xff] }
   0xa   :  { %830 = vmatprep.subr.bf16.mxu1 %v901_v9  ;;  %v917_v25 = vld [vmem:[%s1194_s1 + $0xf0] sm:$0xff]   ;;  %v921_v29 = vld [vmem:[%s1194_s1 + $0xf8] sm:$0xff]   ;;  %v16_v33 = vld [vmem:[%s1195_s0 + $0x8] sm:$0xff]  ;;  %v732_v34 = vcombine.low %v15_v32, %v15_v32  ;;  %v733_v35 = vcombine.high %v15_v32, %v15_v32 }
   0xb   :  { %v918_v26 = vld [vmem:[%s1194_s1 + $0x30] sm:$0xff]   ;;  %v922_v30 = vld [vmem:[%s1194_s1 + $0x38] sm:$0xff]   ;;  %v734_v36 = vcombine.low %v16_v33, %v16_v33  ;;  %v735_v37 = vcombine.high %v16_v33, %v16_v33  ;;  %v928_v38 = vld [vmem:[%s1194_s1 + $0x140] sm:$0xff]  }
   0xc   :  { %809 = vmatpush3.bf16.msra.mxu0 %v902_v10  ;;  %v919_v27 = vld [vmem:[%s1194_s1 + $0xb0] sm:$0xff]   ;;  %v923_v31 = vld [vmem:[%s1194_s1 + $0xb8] sm:$0xff]   ;;  %v929_v39 = vld [vmem:[%s1194_s1 + $0x1c0] sm:$0xff]   ;;  %598 = vmatprep.mubr.bf16.mxu0 %v733_v35 }
   0xd   :  { %831 = vmatpush3.bf16.msra.mxu1 %v903_v11  ;;  %810 = vmatprep.subr.bf16.mxu0 %v904_v12  ;;  %v930_v40 = vld [vmem:[%s1194_s1 + $0x100] sm:$0xff]   ;;  %v932_v42 = vld [vmem:[%s1194_s1 + $0x148] sm:$0xff]   ;;  %v936_v46 = vld [vmem:[%s1194_s1 + $0x150] sm:$0xff]  }
   0xe   :  { %832 = vmatprep.subr.bf16.mxu1 %v905_v13  ;;  %638 = vmatprep.mubr.bf16.mxu1 %v735_v37  ;;  %v931_v41 = vld [vmem:[%s1194_s1 + $0x180] sm:$0xff]   ;;  %v933_v43 = vld [vmem:[%s1194_s1 + $0x1c8] sm:$0xff]   ;;  %v937_v47 = vld [vmem:[%s1194_s1 + $0x1d0] sm:$0xff]  }
   0xf   :  { %v934_v44 = vld [vmem:[%s1194_s1 + $0x108] sm:$0xff]   ;;  %v938_v48 = vld [vmem:[%s1194_s1 + $0x110] sm:$0xff]   ;;  %v940_v50 = vld [vmem:[%s1194_s1 + $0x158] sm:$0xff]  }
  0x10   :  { %811 = vmatpush3.bf16.msra.mxu0 %v906_v14  ;;  %v935_v45 = vld [vmem:[%s1194_s1 + $0x188] sm:$0xff]   ;;  %v939_v49 = vld [vmem:[%s1194_s1 + $0x190] sm:$0xff]   ;;  %v941_v51 = vld [vmem:[%s1194_s1 + $0x1d8] sm:$0xff]  }
  0x11   :  { %833 = vmatpush3.bf16.msra.mxu1 %v907_v15  ;;  %812 = vmatprep.subr.bf16.mxu0 %v908_v16  ;;  %v942_v52 = vld [vmem:[%s1194_s1 + $0x118] sm:$0xff]   ;;  %v944_v54 = vld [vmem:[%s1194_s1 + $0x160] sm:$0xff]   ;;  %v948_v58 = vld [vmem:[%s1194_s1 + $0x168] sm:$0xff]  }
  0x12   :  { %834 = vmatprep.subr.bf16.mxu1 %v909_v17  ;;  %v943_v53 = vld [vmem:[%s1194_s1 + $0x198] sm:$0xff]   ;;  %v945_v55 = vld [vmem:[%s1194_s1 + $0x1e0] sm:$0xff]   ;;  %v949_v59 = vld [vmem:[%s1194_s1 + $0x1e8] sm:$0xff]  }
  0x13   :  { %v946_v56 = vld [vmem:[%s1194_s1 + $0x120] sm:$0xff]   ;;  %v950_v60 = vld [vmem:[%s1194_s1 + $0x128] sm:$0xff]   ;;  %v952_v62 = vld [vmem:[%s1194_s1 + $0x170] sm:$0xff]  }
  0x14   :  { %813 = vmatpush3.bf16.msra.mxu0 %v910_v18  ;;  %v947_v57 = vld [vmem:[%s1194_s1 + $0x1a0] sm:$0xff]   ;;  %v951_v61 = vld [vmem:[%s1194_s1 + $0x1a8] sm:$0xff]   ;;  %v953_v63 = vld [vmem:[%s1194_s1 + $0x1f0] sm:$0xff]  }
  0x15   :  { %835 = vmatpush3.bf16.msra.mxu1 %v911_v19  ;;  %814 = vmatprep.subr.bf16.mxu0 %v912_v20  ;;  %v954_v0 = vld [vmem:[%s1194_s1 + $0x130] sm:$0xff]   ;;  %v956_v2 = vld [vmem:[%s1194_s1 + $0x178] sm:$0xff]   ;;  %v731_v14 = vld [vmem:[%s1196_s2] ss:$0 sm:$0xff] }
  0x16   :  { %836 = vmatprep.subr.bf16.mxu1 %v913_v21  ;;  %v955_v1 = vld [vmem:[%s1194_s1 + $0x1b0] sm:$0xff]   ;;  %v957_v3 = vld [vmem:[%s1194_s1 + $0x1f8] sm:$0xff]  }
  0x17   :  { %v958_v4 = vld [vmem:[%s1194_s1 + $0x138] sm:$0xff]   ;;  %v17_v6 = vld [vmem:[%s1195_s0 + $0x10] sm:$0xff] }
  0x18   :  { %815 = vmatpush3.bf16.msra.mxu0 %v914_v22  ;;  %v959_v5 = vld [vmem:[%s1194_s1 + $0x1b8] sm:$0xff]   ;;  %v736_v7 = vcombine.low %v17_v6, %v17_v6  ;;  %v737_v8 = vcombine.high %v17_v6, %v17_v6 }
  0x19   :  { %837 = vmatpush3.bf16.msra.mxu1 %v915_v23  ;;  %816 = vmatprep.subr.bf16.mxu0 %v916_v24  ;;  %v18_v9 = vld [vmem:[%s1195_s0 + $0x18] sm:$0xff] }
  0x1a   :  { %838 = vmatprep.subr.bf16.mxu1 %v917_v25  ;;  %v738_v10 = vcombine.low %v18_v9, %v18_v9  ;;  %v739_v11 = vcombine.high %v18_v9, %v18_v9 }
  0x1c   :  { %817 = vmatpush3.bf16.msra.mxu0 %v918_v26 }
  0x1d   :  { %839 = vmatpush3.bf16.msra.mxu1 %v919_v27  ;;  %818 = vmatprep.subr.bf16.mxu0 %v920_v28 }
  0x1e   :  { %840 = vmatprep.subr.bf16.mxu1 %v921_v29 }
  0x20   :  { %819 = vmatpush3.bf16.msra.mxu0 %v922_v30 }
  0x21   :  { %841 = vmatpush3.bf16.msra.mxu1 %v923_v31  ;;  %848 = vmatprep.subr.bf16.mxu0 %v928_v38 }
  0x22   :  { %870 = vmatprep.subr.bf16.mxu1 %v929_v39 }
  0x23   :  { %599 = vmatmul.mubr.bf16.vlgmr.msra.gmra.mrb[0].mxu0 %v732_v34 }
  0x24   :  { %639 = vmatmul.mubr.bf16.vlgmr.msra.gmra.mrb[0].mxu1 %v734_v36  ;;  %849 = vmatpush3.bf16.msra.mxu0 %v930_v40 }
  0x25   :  { %871 = vmatpush3.bf16.msra.mxu1 %v931_v41  ;;  %850 = vmatprep.subr.bf16.mxu0 %v932_v42 }
  0x26   :  { %872 = vmatprep.subr.bf16.mxu1 %v933_v43  ;;  %678 = vmatprep.mubr.bf16.mxu0 %v737_v8 }
  0x27   :  { %718 = vmatprep.mubr.bf16.mxu1 %v739_v11 }
  0x28   :  { %851 = vmatpush3.bf16.msra.mxu0 %v934_v44 }
  0x29   :  { %873 = vmatpush3.bf16.msra.mxu1 %v935_v45  ;;  %852 = vmatprep.subr.bf16.mxu0 %v936_v46 }
  0x2a   :  { %874 = vmatprep.subr.bf16.mxu1 %v937_v47 }
  0x2c   :  { %853 = vmatpush3.bf16.msra.mxu0 %v938_v48 }
  0x2d   :  { %875 = vmatpush3.bf16.msra.mxu1 %v939_v49  ;;  %854 = vmatprep.subr.bf16.mxu0 %v940_v50 }
  0x2e   :  { %876 = vmatprep.subr.bf16.mxu1 %v941_v51 }
  0x30   :  { %855 = vmatpush3.bf16.msra.mxu0 %v942_v52 }
  0x31   :  { %877 = vmatpush3.bf16.msra.mxu1 %v943_v53  ;;  %856 = vmatprep.subr.bf16.mxu0 %v944_v54 }
  0x32   :  { %878 = vmatprep.subr.bf16.mxu1 %v945_v55 }
  0x34   :  { %857 = vmatpush3.bf16.msra.mxu0 %v946_v56 }
  0x35   :  { %879 = vmatpush3.bf16.msra.mxu1 %v947_v57  ;;  %858 = vmatprep.subr.bf16.mxu0 %v948_v58 }
  0x36   :  { %880 = vmatprep.subr.bf16.mxu1 %v949_v59 }
  0x38   :  { %859 = vmatpush3.bf16.msra.mxu0 %v950_v60 }
  0x39   :  { %881 = vmatpush3.bf16.msra.mxu1 %v951_v61  ;;  %860 = vmatprep.subr.bf16.mxu0 %v952_v62 }
  0x3a   :  { %882 = vmatprep.subr.bf16.mxu1 %v953_v63 }
  0x3c   :  { %861 = vmatpush3.bf16.msra.mxu0 %v954_v0 }
  0x3d   :  { %883 = vmatpush3.bf16.msra.mxu1 %v955_v1  ;;  %862 = vmatprep.subr.bf16.mxu0 %v956_v2 }
  0x3e   :  { %884 = vmatprep.subr.bf16.mxu1 %v957_v3 }
  0x40   :  { %863 = vmatpush3.bf16.msra.mxu0 %v958_v4 }
  0x41   :  { %885 = vmatpush3.bf16.msra.mxu1 %v959_v5 }
  0x43   :  { %679 = vmatmul.mubr.bf16.vlgmr.msra.gmra.mrb[4].mxu0 %v736_v7 }
  0x44   :  { %719 = vmatmul.mubr.bf16.vlgmr.msra.gmra.mrb[4].mxu1 %v738_v10 }
  0xf6   :  { %v820_v12 = vpop.f32.mrb[0].mxu0 }
  0xf7   :  { %v842_v13 = vpop.f32.mrb[0].mxu1  ;;  %v821_v15 = vpop.f32.mrb[1].mxu0 }
  0xf8   :  { %v843_v16 = vpop.f32.mrb[1].mxu1  ;;  %v822_v17 = vadd.f32 %v821_v15, %v820_v12  ;;  %v823_v19 = vpop.f32.mrb[2].mxu0 }
  0xf9   :  { %v844_v18 = vadd.f32 %v843_v16, %v842_v13  ;;  %v845_v20 = vpop.f32.mrb[2].mxu1  ;;  %v824_v21 = vpop.f32.mrb[3].mxu0 }
  0xfa   :  { %v846_v22 = vpop.f32.mrb[3].mxu1  ;;  %v601_v23 = vadd.f32 %v822_v17, %v731_v14 }
  0xfc   :  { %v641_v24 = vadd.f32 %v844_v18, %v601_v23 }
 0x116   :  { %v864_v25 = vpop.f32.mrb[4].mxu0 }
 0x117   :  { %v886_v26 = vpop.f32.mrb[4].mxu1  ;;  %v865_v27 = vpop.f32.mrb[5].mxu0 }
 0x118   :  { %v887_v28 = vpop.f32.mrb[5].mxu1  ;;  %v866_v29 = vadd.f32 %v865_v27, %v864_v25  ;;  %v867_v31 = vpop.f32.mrb[6].mxu0 }
 0x119   :  { %v888_v30 = vadd.f32 %v887_v28, %v886_v26  ;;  %v889_v32 = vpop.f32.mrb[6].mxu1  ;;  %v868_v33 = vpop.f32.mrb[7].mxu0 }
 0x11a   :  { %v890_v34 = vpop.f32.mrb[7].mxu1  ;;  %v681_v35 = vadd.f32 %v866_v29, %v641_v24 }
 0x11c   :  { %v721_v36 = vadd.f32 %v888_v30, %v681_v35 }
 0x11e   :  { %726 = vst [vmem:[%s1197_s3] sm:$0xff] %v721_v36 }

</bundles_post_ra>
